<compile_context>
chip_gen: v7x
topology: tpu7x:2x2x1
jax: 0.10.0
libtpu: 0.0.40
codegen_flags: <defaults>
</compile_context>

<pallas_src>
import functools
import math

import jax
import jax.numpy as jnp
from jax.experimental import pallas as pl
from jax.experimental.pallas import tpu as pltpu


def _relu_flags(layer_sizes, final_relu):
    """Which linear layers have a ReLU applied to their input (matches torch loop)."""
    num_layers = len(layer_sizes) - 1
    final_relu_layer = num_layers if final_relu else num_layers - 1
    return tuple(i < final_relu_layer for i in range(num_layers))


def prepare_params(torch_params, dot_dtype=jnp.bfloat16):
    """Convert torch-style (W[out,in], b[out]) pairs to kernel layout.

    Weights become (in, out) in `dot_dtype` (bf16 = MXU-native, half the DMA
    bytes); biases become (1, out) float32 (bias-add stays on the f32 VPU path).
    Pass dot_dtype=jnp.float32 for a strict pure-f32 path.
    """
    params = []
    for w, b in torch_params:
        params.append((jnp.asarray(w).T.astype(dot_dtype),
                       jnp.asarray(b).reshape(1, -1).astype(jnp.float32)))
    return params


def _pad_last_layer(params, lane=128):
    """Zero-pad the final layer's output features to a multiple of `lane`.

    A D_out < 128 output block lowers to masked partial stores (vst.msk) using
    only D_out/128 of each store slot; padding makes the store path lane-dense
    and unmasked.  The wrapper slices the logical D_out back out afterwards.
    """
    w_last, b_last = params[-1]
    d_out = w_last.shape[1]
    d_pad = -(-d_out // lane) * lane
    if d_pad == d_out:
        return list(params), d_out, d_out
    w_p = jnp.pad(w_last, ((0, 0), (0, d_pad - d_out)))
    b_p = jnp.pad(b_last, ((0, 0), (0, d_pad - d_out)))
    return list(params[:-1]) + [(w_p, b_p)], d_out, d_pad


def _mlp_kernel(relu_flags, x_ref, *refs):
    """Fused MLP: all layers computed on one batch tile resident in VMEM.

    refs = (w0, b0, w1, b1, ..., w_{L-1}, b_{L-1}, out_ref)
      w_i: (in_i, out_i) in dot dtype (bf16)    b_i: (1, out_i) f32
    """
    out_ref = refs[-1]
    param_refs = refs[:-1]

    h = x_ref[...]                                         # (tb, D_in), f32
    for li, relu_before in enumerate(relu_flags):
        if relu_before:
            h = jnp.maximum(h, 0.0)                        # VPU, f32
        w = param_refs[2 * li][...]                        # bf16 weights
        b = param_refs[2 * li + 1][...]                    # f32 bias
        # MXU matmul: bf16 x bf16 operands, f32 accumulation; bias add in f32.
        h = jnp.dot(h.astype(w.dtype), w,
                    preferred_element_type=jnp.float32) + b
    out_ref[...] = h.astype(out_ref.dtype)                 # lane-dense store


def mlp_forward(x, params, relu_flags, *, tb=None, single_buffer_weights=True):
    """params: list of (w_t, b) with w_t shape (in, out), b shape (1, out)."""
    B, D_in = x.shape
    params, D_out, D_out_pad = _pad_last_layer(params)

    # --- batch tiling --------------------------------------------------------
    # Per-grid-step overhead (~0.35us, ~600 cycles) dominates these tiny
    # matmuls, so use the largest batch tile that fits VMEM: grid=(1,) for
    # B<=256.  NOTE(v7x): with 2 TensorCores prefer an even grid (tb=B//2) so
    # the "parallel" batch axis shards across both cores.
    if tb is None:
        tb = min(B, 256)
    tb = max(8, ((tb + 7) // 8) * 8)
    B_pad = -(-B // tb) * tb
    if B_pad != B:
        x = jnp.pad(x, ((0, B_pad - B), (0, 0)))
    grid = (B_pad // tb,)

    flat_params = [p for wb in params for p in wb]

    def build_specs(use_single_buffer):
        in_specs = [pl.BlockSpec((tb, D_in), lambda i: (i, 0))]
        for (w_t, b) in params:
            kw = {}
            if use_single_buffer:
                # Grid-invariant blocks: no need for double-buffered VMEM.
                kw = dict(pipeline_mode=pl.Buffered(1))
            in_specs.append(pl.BlockSpec(w_t.shape, lambda i: (0, 0), **kw))
            in_specs.append(pl.BlockSpec(b.shape, lambda i: (0, 0), **kw))
        return in_specs

    out_spec = pl.BlockSpec((tb, D_out_pad), lambda i: (i, 0))
    out_shape = jax.ShapeDtypeStruct((B_pad, D_out_pad), x.dtype)

    # Cost hint so XLA can schedule/overlap this tiny custom call.
    flops = 2 * B_pad * sum(w.shape[0] * w.shape[1] for w, _ in params)
    bytes_accessed = (x.size * x.dtype.itemsize
                      + sum(w.size * w.dtype.itemsize + b.size * b.dtype.itemsize
                            for w, b in params)
                      + B_pad * D_out_pad * x.dtype.itemsize)
    cost = pl.CostEstimate(flops=flops, transcendentals=0,
                           bytes_accessed=bytes_accessed)

    # Explicit VMEM budget: x tile (double-buffered) + resident weights/biases
    # + activation intermediates + output tile (double-buffered), with margin.
    widths = [D_in, D_out_pad] + [w.shape[1] for w, _ in params]
    param_bytes = sum(w.size * w.dtype.itemsize + b.size * b.dtype.itemsize
                      for w, b in params)
    vmem_needed = (2 * tb * D_in * 4
                   + param_bytes
                   + 4 * tb * max(widths) * 4
                   + 2 * tb * D_out_pad * 4)
    vmem_limit = int(min(max(2 * vmem_needed, 8 << 20), 48 << 20))

    kernel = functools.partial(_mlp_kernel, relu_flags)

    def call(in_specs):
        return pl.pallas_call(
            kernel,
            out_shape=out_shape,
            grid_spec=pltpu.PrefetchScalarGridSpec(
                num_scalar_prefetch=0,
                grid=grid,
                in_specs=in_specs,
                out_specs=out_spec,
            ),
            compiler_params=pltpu.CompilerParams(
                dimension_semantics=("parallel",),
                vmem_limit_bytes=vmem_limit),
            cost_estimate=cost,
        )(x, *flat_params)

    if single_buffer_weights:
        try:
            out = call(build_specs(True))
        except Exception:
            # pipeline_mode / buffer_count=1 support differs across jax
            # versions; fall back to default double-buffering (harmless here).
            out = call(build_specs(False))
    else:
        out = call(build_specs(False))

    return out[:B, :D_out]


def mlp_reference(x, params, relu_flags):
    """Pure-JAX reference with the same bf16-dot / f32-accumulate numerics."""
    h = x
    for (w_t, b), relu_before in zip(params, relu_flags):
        if relu_before:
            h = jnp.maximum(h, 0.0)
        h = jnp.dot(h.astype(w_t.dtype), w_t,
                    preferred_element_type=jnp.float32) + b
    return h


if __name__ == "__main__":
    # MLP([32, 64, 64, 16], final_relu=False)
    #   => net = [ReLU, Linear(32,64), ReLU, Linear(64,64), Linear(64,16)]
    layer_sizes = [32, 64, 64, 16]
    final_relu = False
    relu_flags = _relu_flags(layer_sizes, final_relu)

    key = jax.random.PRNGKey(0)
    B = 128
    key, kx = jax.random.split(key)
    x = jax.random.normal(kx, (B, layer_sizes[0]), dtype=jnp.float32)

    # Deterministic parameter init (PyTorch-style uniform bounds, synthetic).
    torch_params = []
    for i in range(len(layer_sizes) - 1):
        fan_in, fan_out = layer_sizes[i], layer_sizes[i + 1]
        key, kw, kb = jax.random.split(key, 3)
        bound = 1.0 / math.sqrt(fan_in)
        w = jax.random.uniform(kw, (fan_out, fan_in), jnp.float32, -bound, bound)
        b = jax.random.uniform(kb, (fan_out,), jnp.float32, -bound, bound)
        torch_params.append((w, b))

    # Kernel layout: (in, out) bf16 weights, (1, out) f32 biases.
    params = prepare_params(torch_params, dot_dtype=jnp.bfloat16)

    out = mlp_forward(x, params, relu_flags)   # tb auto -> 128, grid=(1,)
    out = jax.block_until_ready(out)

    ref = mlp_reference(x, params, relu_flags)
    assert out.shape == (B, layer_sizes[-1])
    max_err = float(jnp.max(jnp.abs(out - ref)))
    assert jnp.allclose(out, ref, atol=1e-2, rtol=1e-2), max_err
    print("KERNEL_OK")
</pallas_src>

<mosaic_0001>
module attributes {stable_mosaic.version = 11 : i64} {
  func.func @_mlp_kernel(%arg0: i32, %arg1: memref<128x32xf32, #tpu.memory_space<vmem>>, %arg2: memref<32x64xbf16, #tpu.memory_space<vmem>>, %arg3: memref<1x64xf32, #tpu.memory_space<vmem>>, %arg4: memref<64x64xbf16, #tpu.memory_space<vmem>>, %arg5: memref<1x64xf32, #tpu.memory_space<vmem>>, %arg6: memref<64x128xbf16, #tpu.memory_space<vmem>>, %arg7: memref<1x128xf32, #tpu.memory_space<vmem>>, %arg8: memref<128x128xf32, #tpu.memory_space<vmem>>) attributes {dimension_semantics = [#tpu.dimension_semantics<parallel>], iteration_bounds = array<i64: 1>, scalar_prefetch = 0 : i64, scratch_operands = 0 : i64, tpu.core_type = #tpu.core_type<tc>, window_params = [{transform_indices = @transform_0, window_bounds = array<i64: 128, 32>}, {pipeline_mode = #tpu.pipeline_mode<synchronous>, transform_indices = @transform_1, window_bounds = array<i64: 32, 64>}, {pipeline_mode = #tpu.pipeline_mode<synchronous>, transform_indices = @transform_2, window_bounds = array<i64: 1, 64>}, {pipeline_mode = #tpu.pipeline_mode<synchronous>, transform_indices = @transform_3, window_bounds = array<i64: 64, 64>}, {pipeline_mode = #tpu.pipeline_mode<synchronous>, transform_indices = @transform_4, window_bounds = array<i64: 1, 64>}, {pipeline_mode = #tpu.pipeline_mode<synchronous>, transform_indices = @transform_5, window_bounds = array<i64: 64, 128>}, {pipeline_mode = #tpu.pipeline_mode<synchronous>, transform_indices = @transform_6, window_bounds = array<i64: 1, 128>}, {transform_indices = @transform_7, window_bounds = array<i64: 128, 128>}]} {
    %c0 = arith.constant 0 : index
    %c0_0 = arith.constant 0 : index
    %0 = vector.load %arg1[%c0, %c0_0] : memref<128x32xf32, #tpu.memory_space<vmem>>, vector<128x32xf32>
    %cst = arith.constant 0.000000e+00 : f32
    %1 = vector.broadcast %cst : f32 to vector<128x32xf32>
    %2 = arith.maximumf %0, %1 : vector<128x32xf32>
    %c0_1 = arith.constant 0 : index
    %c0_2 = arith.constant 0 : index
    %3 = vector.load %arg2[%c0_1, %c0_2] : memref<32x64xbf16, #tpu.memory_space<vmem>>, vector<32x64xbf16>
    %c0_3 = arith.constant 0 : index
    %c0_4 = arith.constant 0 : index
    %4 = vector.load %arg3[%c0_3, %c0_4] : memref<1x64xf32, #tpu.memory_space<vmem>>, vector<1x64xf32>
    %5 = arith.truncf %2 : vector<128x32xf32> to vector<128x32xbf16>
    %cst_5 = arith.constant dense<0.000000e+00> : vector<128x64xf32>
    %6 = tpu.matmul %5, %3, %cst_5 {dimension_numbers = #tpu.dot_dimension_numbers<[1], [0], [0], [1], [0, 0, 1, 1], [], []>} : vector<128x32xbf16>, vector<32x64xbf16>, vector<128x64xf32> -> vector<128x64xf32>
    %7 = vector.broadcast %4 : vector<1x64xf32> to vector<128x64xf32>
    %8 = arith.addf %6, %7 : vector<128x64xf32>
    %cst_6 = arith.constant 0.000000e+00 : f32
    %9 = vector.broadcast %cst_6 : f32 to vector<128x64xf32>
    %10 = arith.maximumf %8, %9 : vector<128x64xf32>
    %c0_7 = arith.constant 0 : index
    %c0_8 = arith.constant 0 : index
    %11 = vector.load %arg4[%c0_7, %c0_8] : memref<64x64xbf16, #tpu.memory_space<vmem>>, vector<64x64xbf16>
    %c0_9 = arith.constant 0 : index
    %c0_10 = arith.constant 0 : index
    %12 = vector.load %arg5[%c0_9, %c0_10] : memref<1x64xf32, #tpu.memory_space<vmem>>, vector<1x64xf32>
    %13 = arith.truncf %10 : vector<128x64xf32> to vector<128x64xbf16>
    %cst_11 = arith.constant dense<0.000000e+00> : vector<128x64xf32>
    %14 = tpu.matmul %13, %11, %cst_11 {dimension_numbers = #tpu.dot_dimension_numbers<[1], [0], [0], [1], [0, 0, 1, 1], [], []>} : vector<128x64xbf16>, vector<64x64xbf16>, vector<128x64xf32> -> vector<128x64xf32>
    %15 = vector.broadcast %12 : vector<1x64xf32> to vector<128x64xf32>
    %16 = arith.addf %14, %15 : vector<128x64xf32>
    %c0_12 = arith.constant 0 : index
    %c0_13 = arith.constant 0 : index
    %17 = vector.load %arg6[%c0_12, %c0_13] : memref<64x128xbf16, #tpu.memory_space<vmem>>, vector<64x128xbf16>
    %c0_14 = arith.constant 0 : index
    %c0_15 = arith.constant 0 : index
    %18 = vector.load %arg7[%c0_14, %c0_15] : memref<1x128xf32, #tpu.memory_space<vmem>>, vector<1x128xf32>
    %19 = arith.truncf %16 : vector<128x64xf32> to vector<128x64xbf16>
    %cst_16 = arith.constant dense<0.000000e+00> : vector<128x128xf32>
    %20 = tpu.matmul %19, %17, %cst_16 {dimension_numbers = #tpu.dot_dimension_numbers<[1], [0], [0], [1], [0, 0, 1, 1], [], []>} : vector<128x64xbf16>, vector<64x128xbf16>, vector<128x128xf32> -> vector<128x128xf32>
    %21 = vector.broadcast %18 : vector<1x128xf32> to vector<128x128xf32>
    %22 = arith.addf %20, %21 : vector<128x128xf32>
    %c0_17 = arith.constant 0 : index
    %c0_18 = arith.constant 0 : index
    %23 = vector.load %arg8[%c0_17, %c0_18] : memref<128x128xf32, #tpu.memory_space<vmem>>, vector<128x128xf32>
    tpu.vector_store %arg8[%c0_17, %c0_18], %22 {strides = array<i32>} : memref<128x128xf32, #tpu.memory_space<vmem>>, vector<128x128xf32>,
    return
  }
  func.func @transform_0(%arg0: i32) -> (i32, i32) {
    %c0_i32 = arith.constant 0 : i32
    %c0_i32_0 = arith.constant 0 : i32
    return %arg0, %c0_i32 : i32, i32
  }
  func.func @transform_1(%arg0: i32) -> (i32, i32) {
    %c0_i32 = arith.constant 0 : i32
    %c0_i32_0 = arith.constant 0 : i32
    %c0_i32_1 = arith.constant 0 : i32
    return %c0_i32, %c0_i32_0 : i32, i32
  }
  func.func @transform_2(%arg0: i32) -> (i32, i32) {
    %c0_i32 = arith.constant 0 : i32
    %c0_i32_0 = arith.constant 0 : i32
    %c0_i32_1 = arith.constant 0 : i32
    return %c0_i32, %c0_i32_0 : i32, i32
  }
  func.func @transform_3(%arg0: i32) -> (i32, i32) {
    %c0_i32 = arith.constant 0 : i32
    %c0_i32_0 = arith.constant 0 : i32
    %c0_i32_1 = arith.constant 0 : i32
    return %c0_i32, %c0_i32_0 : i32, i32
  }
  func.func @transform_4(%arg0: i32) -> (i32, i32) {
    %c0_i32 = arith.constant 0 : i32
    %c0_i32_0 = arith.constant 0 : i32
    %c0_i32_1 = arith.constant 0 : i32
    return %c0_i32, %c0_i32_0 : i32, i32
  }
  func.func @transform_5(%arg0: i32) -> (i32, i32) {
    %c0_i32 = arith.constant 0 : i32
    %c0_i32_0 = arith.constant 0 : i32
    %c0_i32_1 = arith.constant 0 : i32
    return %c0_i32, %c0_i32_0 : i32, i32
  }
  func.func @transform_6(%arg0: i32) -> (i32, i32) {
    %c0_i32 = arith.constant 0 : i32
    %c0_i32_0 = arith.constant 0 : i32
    %c0_i32_1 = arith.constant 0 : i32
    return %c0_i32, %c0_i32_0 : i32, i32
  }
  func.func @transform_7(%arg0: i32) -> (i32, i32) {
    %c0_i32 = arith.constant 0 : i32
    %c0_i32_0 = arith.constant 0 : i32
    return %arg0, %c0_i32 : i32, i32
  }
}

module attributes {stable_mosaic.version = 11 : i64} {
  func.func @_mlp_kernel(%arg0: i32, %arg1: memref<128x32xf32, #tpu.memory_space<vmem>>, %arg2: memref<32x64xbf16, #tpu.memory_space<vmem>>, %arg3: memref<1x64xf32, #tpu.memory_space<vmem>>, %arg4: memref<64x64xbf16, #tpu.memory_space<vmem>>, %arg5: memref<1x64xf32, #tpu.memory_space<vmem>>, %arg6: memref<64x128xbf16, #tpu.memory_space<vmem>>, %arg7: memref<1x128xf32, #tpu.memory_space<vmem>>, %arg8: memref<128x128xf32, #tpu.memory_space<vmem>>) attributes {dimension_semantics = [#tpu.dimension_semantics<parallel>], iteration_bounds = array<i64: 1>, scalar_prefetch = 0 : i64, scratch_operands = 0 : i64, tpu.core_type = #tpu.core_type<tc>, window_params = [{transform_indices = @transform_0, window_bounds = array<i64: 128, 32>}, {pipeline_mode = #tpu.pipeline_mode<synchronous>, transform_indices = @transform_1, window_bounds = array<i64: 32, 64>}, {pipeline_mode = #tpu.pipeline_mode<synchronous>, transform_indices = @transform_2, window_bounds = array<i64: 1, 64>}, {pipeline_mode = #tpu.pipeline_mode<synchronous>, transform_indices = @transform_3, window_bounds = array<i64: 64, 64>}, {pipeline_mode = #tpu.pipeline_mode<synchronous>, transform_indices = @transform_4, window_bounds = array<i64: 1, 64>}, {pipeline_mode = #tpu.pipeline_mode<synchronous>, transform_indices = @transform_5, window_bounds = array<i64: 64, 128>}, {pipeline_mode = #tpu.pipeline_mode<synchronous>, transform_indices = @transform_6, window_bounds = array<i64: 1, 128>}, {transform_indices = @transform_7, window_bounds = array<i64: 128, 128>}]} {
    %c0 = arith.constant 0 : index
    %c0_0 = arith.constant 0 : index
    %0 = vector.load %arg1[%c0, %c0_0] : memref<128x32xf32, #tpu.memory_space<vmem>>, vector<128x32xf32>
    %cst = arith.constant 0.000000e+00 : f32
    %1 = vector.broadcast %cst : f32 to vector<128x32xf32>
    %2 = arith.maximumf %0, %1 : vector<128x32xf32>
    %c0_1 = arith.constant 0 : index
    %c0_2 = arith.constant 0 : index
    %3 = vector.load %arg2[%c0_1, %c0_2] : memref<32x64xbf16, #tpu.memory_space<vmem>>, vector<32x64xbf16>
    %c0_3 = arith.constant 0 : index
    %c0_4 = arith.constant 0 : index
    %4 = vector.load %arg3[%c0_3, %c0_4] : memref<1x64xf32, #tpu.memory_space<vmem>>, vector<1x64xf32>
    %5 = arith.truncf %2 : vector<128x32xf32> to vector<128x32xbf16>
    %cst_5 = arith.constant dense<0.000000e+00> : vector<128x64xf32>
    %6 = tpu.matmul %5, %3, %cst_5 {dimension_numbers = #tpu.dot_dimension_numbers<[1], [0], [0], [1], [0, 0, 1, 1], [], []>} : vector<128x32xbf16>, vector<32x64xbf16>, vector<128x64xf32> -> vector<128x64xf32>
    %7 = vector.broadcast %4 : vector<1x64xf32> to vector<128x64xf32>
    %8 = arith.addf %6, %7 : vector<128x64xf32>
    %cst_6 = arith.constant 0.000000e+00 : f32
    %9 = vector.broadcast %cst_6 : f32 to vector<128x64xf32>
    %10 = arith.maximumf %8, %9 : vector<128x64xf32>
    %c0_7 = arith.constant 0 : index
    %c0_8 = arith.constant 0 : index
    %11 = vector.load %arg4[%c0_7, %c0_8] : memref<64x64xbf16, #tpu.memory_space<vmem>>, vector<64x64xbf16>
    %c0_9 = arith.constant 0 : index
    %c0_10 = arith.constant 0 : index
    %12 = vector.load %arg5[%c0_9, %c0_10] : memref<1x64xf32, #tpu.memory_space<vmem>>, vector<1x64xf32>
    %13 = arith.truncf %10 : vector<128x64xf32> to vector<128x64xbf16>
    %cst_11 = arith.constant dense<0.000000e+00> : vector<128x64xf32>
    %14 = tpu.matmul %13, %11, %cst_11 {dimension_numbers = #tpu.dot_dimension_numbers<[1], [0], [0], [1], [0, 0, 1, 1], [], []>} : vector<128x64xbf16>, vector<64x64xbf16>, vector<128x64xf32> -> vector<128x64xf32>
    %15 = vector.broadcast %12 : vector<1x64xf32> to vector<128x64xf32>
    %16 = arith.addf %14, %15 : vector<128x64xf32>
    %c0_12 = arith.constant 0 : index
    %c0_13 = arith.constant 0 : index
    %17 = vector.load %arg6[%c0_12, %c0_13] : memref<64x128xbf16, #tpu.memory_space<vmem>>, vector<64x128xbf16>
    %c0_14 = arith.constant 0 : index
    %c0_15 = arith.constant 0 : index
    %18 = vector.load %arg7[%c0_14, %c0_15] : memref<1x128xf32, #tpu.memory_space<vmem>>, vector<1x128xf32>
    %19 = arith.truncf %16 : vector<128x64xf32> to vector<128x64xbf16>
    %cst_16 = arith.constant dense<0.000000e+00> : vector<128x128xf32>
    %20 = tpu.matmul %19, %17, %cst_16 {dimension_numbers = #tpu.dot_dimension_numbers<[1], [0], [0], [1], [0, 0, 1, 1], [], []>} : vector<128x64xbf16>, vector<64x128xbf16>, vector<128x128xf32> -> vector<128x128xf32>
    %21 = vector.broadcast %18 : vector<1x128xf32> to vector<128x128xf32>
    %22 = arith.addf %20, %21 : vector<128x128xf32>
    %c0_17 = arith.constant 0 : index
    %c0_18 = arith.constant 0 : index
    %23 = vector.load %arg8[%c0_17, %c0_18] : memref<128x128xf32, #tpu.memory_space<vmem>>, vector<128x128xf32>
    tpu.vector_store %arg8[%c0_17, %c0_18], %22 {strides = array<i32>} : memref<128x128xf32, #tpu.memory_space<vmem>>, vector<128x128xf32>,
    return
  }
  func.func @transform_0(%arg0: i32) -> (i32, i32) {
    %c0_i32 = arith.constant 0 : i32
    %c0_i32_0 = arith.constant 0 : i32
    return %arg0, %c0_i32 : i32, i32
  }
  func.func @transform_1(%arg0: i32) -> (i32, i32) {
    %c0_i32 = arith.constant 0 : i32
    %c0_i32_0 = arith.constant 0 : i32
    %c0_i32_1 = arith.constant 0 : i32
    return %c0_i32, %c0_i32_0 : i32, i32
  }
  func.func @transform_2(%arg0: i32) -> (i32, i32) {
    %c0_i32 = arith.constant 0 : i32
    %c0_i32_0 = arith.constant 0 : i32
    %c0_i32_1 = arith.constant 0 : i32
    return %c0_i32, %c0_i32_0 : i32, i32
  }
  func.func @transform_3(%arg0: i32) -> (i32, i32) {
    %c0_i32 = arith.constant 0 : i32
    %c0_i32_0 = arith.constant 0 : i32
    %c0_i32_1 = arith.constant 0 : i32
    return %c0_i32, %c0_i32_0 : i32, i32
  }
  func.func @transform_4(%arg0: i32) -> (i32, i32) {
    %c0_i32 = arith.constant 0 : i32
    %c0_i32_0 = arith.constant 0 : i32
    %c0_i32_1 = arith.constant 0 : i32
    return %c0_i32, %c0_i32_0 : i32, i32
  }
  func.func @transform_5(%arg0: i32) -> (i32, i32) {
    %c0_i32 = arith.constant 0 : i32
    %c0_i32_0 = arith.constant 0 : i32
    %c0_i32_1 = arith.constant 0 : i32
    return %c0_i32, %c0_i32_0 : i32, i32
  }
  func.func @transform_6(%arg0: i32) -> (i32, i32) {
    %c0_i32 = arith.constant 0 : i32
    %c0_i32_0 = arith.constant 0 : i32
    %c0_i32_1 = arith.constant 0 : i32
    return %c0_i32, %c0_i32_0 : i32, i32
  }
  func.func @transform_7(%arg0: i32) -> (i32, i32) {
    %c0_i32 = arith.constant 0 : i32
    %c0_i32_0 = arith.constant 0 : i32
    return %arg0, %c0_i32 : i32, i32
  }
}

</mosaic_0001>

<bundles_post_ra>
// kernel: tpu_custom_call.1
= control target key start
LH: loop header
LB: loop body
LE: loop exit
PB: predicated region body
PF: predicated region fallthrough
CT: control target
= control target key end

     0   :  { %vm91_vm0 = vcmask 261120   ;;  %s944_s0 = inlined_call_operand.vmem [shape: f32[128,32], index: 0, kind: input, shape index: {}]   ;;  %s945_s1 = inlined_call_operand.vmem [shape: bf16[32,64], index: 1, kind: input, shape index: {}]   ;;  %s946_s2 = inlined_call_operand.vmem [shape: f32[1,64], index: 2, kind: input, shape index: {}]   ;;  %s947_s3 = inlined_call_operand.vmem [shape: bf16[64,64], index: 3, kind: input, shape index: {}]   ;;  %s948_s4 = inlined_call_operand.vmem [shape: f32[1,64], index: 4, kind: input, shape index: {}]   ;;  %s949_s5 = inlined_call_operand.vmem [shape: bf16[64,128], index: 5, kind: input, shape index: {}]   ;;  %s950_s6 = inlined_call_operand.vmem [shape: f32[1,128], index: 6, kind: input, shape index: {}]   ;;  %s951_s7 = inlined_call_operand.hbm [shape: f32[128,128], index: 7, kind: output, shape index: {}]  }
   0x1   :  { %v744_v0 = vld [vmem:[%s945_s1] sm:$0xff]   ;;  %v745_v1 = vld [vmem:[%s945_s1 + $0x8] sm:$0xff]   ;;  %v30_v4 = vld [vmem:[%s944_s0 + $0x10] sm:$0xff] }
   0x2   :  { %669 = vmatprep.subr.bf16.mxu0 %v744_v0  ;;  %v28_v2 = vld [vmem:[%s944_s0] sm:$0xff]  ;;  %v29_v3 = vld [vmem:[%s944_s0 + $0x8] sm:$0xff]  ;;  %737 = vmatprep.subr.bf16.mxu1 %v744_v0  ;;  %v31_v7 = vld [vmem:[%s944_s0 + $0x18] sm:$0xff]  ;;  %v46_v8 = vmax.f32 %v30_v4, 0.0 }
   0x3   :  { %670 = vmatpush3.bf16.msra.mxu0 %v744_v0  ;;  %v44_v5 = vmax.f32 %v28_v2, 0.0  ;;  %v45_v6 = vmax.f32 %v29_v3, 0.0  ;;  %739 = vmatpush3.bf16.msra.mxu1 %v744_v0  ;;  %v32_v9 = vld [vmem:[%s944_s0 + $0x20] sm:$0xff]  ;;  %v33_v10 = vld [vmem:[%s944_s0 + $0x28] sm:$0xff]  ;;  %v47_v11 = vmax.f32 %v31_v7, 0.0  ;;  %v34_v14 = vld [vmem:[%s944_s0 + $0x30] sm:$0xff] }
   0x4   :  { %671 = vmatprep.subr.bf16.mxu0 %v745_v1  ;;  %v48_v12 = vmax.f32 %v32_v9, 0.0  ;;  %v49_v13 = vmax.f32 %v33_v10, 0.0  ;;  %v35_v15 = vld [vmem:[%s944_s0 + $0x38] sm:$0xff]  ;;  %738 = vmatprep.subr.bf16.mxu1 %v745_v1  ;;  %v36_v16 = vld [vmem:[%s944_s0 + $0x40] sm:$0xff]  ;;  %v50_v18 = vmax.f32 %v34_v14, 0.0  ;;  %v37_v19 = vld [vmem:[%s944_s0 + $0x48] sm:$0xff] }
   0x5   :  { %v65_v17 = vpack.c.bf16 %v45_v6, %v44_v5  ;;  %v52_v20 = vmax.f32 %v36_v16, 0.0  ;;  %v38_v21 = vld [vmem:[%s944_s0 + $0x50] sm:$0xff]  ;;  %v39_v22 = vld [vmem:[%s944_s0 + $0x58] sm:$0xff]  ;;  %v66_v23 = vpack.c.bf16 %v47_v11, %v46_v8  ;;  %v51_v24 = vmax.f32 %v35_v15, 0.0  ;;  %v40_v27 = vld [vmem:[%s944_s0 + $0x60] sm:$0xff] }
   0x6   :  { %v53_v25 = vmax.f32 %v37_v19, 0.0  ;;  %v54_v26 = vmax.f32 %v38_v21, 0.0  ;;  %v41_v28 = vld [vmem:[%s944_s0 + $0x68] sm:$0xff]  ;;  %v42_v29 = vld [vmem:[%s944_s0 + $0x70] sm:$0xff]  ;;  %v67_v30 = vpack.c.bf16 %v49_v13, %v48_v12  ;;  %v55_v31 = vmax.f32 %v39_v22, 0.0  ;;  %v43_v34 = vld [vmem:[%s944_s0 + $0x78] sm:$0xff] }
   0x7   :  { %672 = vmatpush3.bf16.msra.mxu0 %v745_v1  ;;  %673 = vmatprep.mubr.msk.bf16.mxu0 %vm91_vm0, %v65_v17  ;;  %v56_v32 = vmax.f32 %v40_v27, 0.0  ;;  %v57_v33 = vmax.f32 %v41_v28, 0.0  ;;  %v58_v36 = vmax.f32 %v42_v29, 0.0  ;;  %v59_v37 = vmax.f32 %v43_v34, 0.0  ;;  %v746_v38 = vld [vmem:[%s947_s3] sm:$0xff]   ;;  %v747_v39 = vld [vmem:[%s947_s3 + $0x8] sm:$0xff]  }
   0x8   :  { %740 = vmatpush3.bf16.msra.mxu1 %v745_v1  ;;  %v69_v35 = vpack.c.bf16 %v53_v25, %v52_v20  ;;  %v70_v40 = vpack.c.bf16 %v55_v31, %v54_v26 }
   0x9   :  { %v71_v41 = vpack.c.bf16 %v57_v33, %v56_v32  ;;  %689 = vmatprep.subr.bf16.mxu1 %v746_v38 }
   0xa   :  { %674 = vmatmul.mubr.msk.bf16.vlgmr.msra.gmra.mrb[0].mxu0 %vm91_vm0, %v66_v23  ;;  %681 = vmatprep.mubr.msk.bf16.mxu1 %vm91_vm0, %v69_v35 }
   0xb   :  { %677 = vmatprep.mubr.msk.bf16.mxu0 %vm91_vm0, %v67_v30  ;;  %682 = vmatmul.mubr.msk.bf16.vlgmr.msra.gmra.mrb[0].mxu1 %vm91_vm0, %v70_v40 }
   0xc   :  { %685 = vmatprep.mubr.msk.bf16.mxu1 %vm91_vm0, %v71_v41  ;;  %690 = vmatpush3.bf16.msra.mxu1 %v746_v38 }
   0xd   :  { %12 = vsyncpa [#allocation3], 0  ;;  %v68_v42 = vpack.c.bf16 %v51_v24, %v50_v18  ;;  %691 = vmatprep.subr.bf16.mxu1 %v747_v39  ;;  %v72_v43 = vpack.c.bf16 %v59_v37, %v58_v36  ;;  %v748_v44 = vld [vmem:[%s947_s3 + $0x10] sm:$0xff]   ;;  %v749_v45 = vld [vmem:[%s947_s3 + $0x18] sm:$0xff]   ;;  %vm276_vm1 = vcmask 523264  }
   0xe   :  { %v750_v46 = vld [vmem:[%s949_s5] sm:$0xff]   ;;  %v751_v47 = vld [vmem:[%s949_s5 + $0x8] sm:$0xff]   ;;  %v752_v41 = vld [vmem:[%s949_s5 + $0x10] sm:$0xff]  }
   0xf   :  { %713 = vmatprep.subr.bf16.mxu0 %v750_v46  ;;  %v598_v48 = vld [vmem:[%s946_s2] ss:$0 sm:$0xff] }
  0x10   :  { %692 = vmatpush3.bf16.msra.mxu1 %v747_v39  ;;  %714 = vmatpush3.bf16.msra.mxu0 %v750_v46 }
  0x11   :  { %693 = vmatprep.subr.bf16.mxu1 %v748_v44  ;;  %715 = vmatprep.subr.bf16.mxu0 %v751_v47 }
  0x12   :  { %678 = vmatmul.mubr.msk.bf16.gmra.mrb[4].mxu0 %vm91_vm0, %v68_v42  ;;  %v753_v42 = vld [vmem:[%s949_s5 + $0x18] sm:$0xff]  }
  0x13   :  { %686 = vmatmul.mubr.msk.bf16.gmra.mrb[4].mxu1 %vm91_vm0, %v72_v43 }
  0x14   :  { %694 = vmatpush3.bf16.msra.mxu1 %v748_v44  ;;  %716 = vmatpush3.bf16.msra.mxu0 %v751_v47  ;;  %v609_v44 = vld [vmem:[%s948_s4] ss:$0 sm:$0xff] }
  0x15   :  { %695 = vmatprep.subr.bf16.mxu1 %v749_v45  ;;  %717 = vmatprep.subr.bf16.mxu0 %v752_v41 }
  0x18   :  { %696 = vmatpush3.bf16.msra.mxu1 %v749_v45  ;;  %718 = vmatpush3.bf16.msra.mxu0 %v752_v41 }
  0x19   :  { %719 = vmatprep.subr.bf16.mxu0 %v753_v42 }
  0x1c   :  { %720 = vmatpush3.bf16.msra.mxu0 %v753_v42 }
  0xdd   :  { %v675_v49 = vpop.f32.mrb[0].mxu0 }
  0xde   :  { %v159_v50 = vadd.f32 %v675_v49, %v598_v48  ;;  %v150_v51 = vpop.f32.mrb[1].mxu0  ;;  %v683_v52 = vpop.f32.mrb[0].mxu1 }
  0xdf   :  { %v151_v53 = vadd.f32 %v598_v48, %v150_v51  ;;  %v676_v54 = vpop.f32.mrb[2].mxu0  ;;  %v191_v55 = vadd.f32 %v683_v52, %v598_v48  ;;  %v182_v56 = vpop.f32.mrb[1].mxu1 }
  0xe0   :  { %v162_v57 = vadd.f32 %v676_v54, %v598_v48  ;;  %v153_v58 = vpop.f32.mrb[3].mxu0  ;;  %v183_v59 = vadd.f32 %v598_v48, %v182_v56  ;;  %v684_v60 = vpop.f32.mrb[2].mxu1  ;;  %v215_v1 = vmax.f32 %v159_v50, 0.0 }
  0xe1   :  { %v154_v61 = vadd.f32 %v598_v48, %v153_v58  ;;  %v223_v62 = vmax.f32 %v191_v55, 0.0  ;;  %v194_v63 = vadd.f32 %v684_v60, %v598_v48  ;;  %v185_v0 = vpop.f32.mrb[3].mxu1  ;;  %v213_v5 = vmax.f32 %v151_v53, 0.0 }
  0xe2   :  { %v216_v2 = vmax.f32 %v162_v57, 0.0  ;;  %v221_v3 = vmax.f32 %v183_v59, 0.0  ;;  %v186_v4 = vadd.f32 %v598_v48, %v185_v0 }
  0xe3   :  { %v214_v6 = vmax.f32 %v154_v61, 0.0  ;;  %v224_v7 = vmax.f32 %v194_v63, 0.0 }
  0xe4   :  { %v239_v8 = vpack.c.bf16 %v216_v2, %v215_v1  ;;  %v222_v9 = vmax.f32 %v186_v4, 0.0 }
  0xe5   :  { %v238_v10 = vpack.c.bf16 %v214_v6, %v213_v5  ;;  %v679_v11 = vpop.f32.mrb[4].mxu0  ;;  %v243_v12 = vpack.c.bf16 %v224_v7, %v223_v62 }
  0xe6   :  { %v175_v13 = vadd.f32 %v679_v11, %v598_v48  ;;  %v166_v14 = vpop.f32.mrb[5].mxu0  ;;  %v242_v15 = vpack.c.bf16 %v222_v9, %v221_v3  ;;  %v687_v16 = vpop.f32.mrb[4].mxu1 }
  0xe7   :  { %v167_v17 = vadd.f32 %v598_v48, %v166_v14  ;;  %v680_v18 = vpop.f32.mrb[6].mxu0  ;;  %697 = vmatprep.mubr.msk.bf16.mxu1 %vm276_vm1, %v238_v10  ;;  %v207_v19 = vadd.f32 %v687_v16, %v598_v48  ;;  %v198_v20 = vpop.f32.mrb[5].mxu1 }
  0xe8   :  { %v178_v21 = vadd.f32 %v680_v18, %v598_v48  ;;  %v169_v22 = vpop.f32.mrb[7].mxu0  ;;  %698 = vmatmul.mubr.msk.bf16.vlgmr.msra.gmra.mrb[8].mxu1 %vm276_vm1, %v239_v8  ;;  %v199_v23 = vadd.f32 %v598_v48, %v198_v20  ;;  %v688_v24 = vpop.f32.mrb[6].mxu1  ;;  %v219_v29 = vmax.f32 %v175_v13, 0.0  ;;  %v622_v20 = vld [vmem:[%s950_s6] ss:$0 sm:$0xff]  ;;  %s778_s6 = smov [#allocation2]  }
  0xe9   :  { %v170_v25 = vadd.f32 %v598_v48, %v169_v22  ;;  %v227_v26 = vmax.f32 %v207_v19, 0.0  ;;  %v210_v27 = vadd.f32 %v688_v24, %v598_v48  ;;  %v201_v28 = vpop.f32.mrb[7].mxu1  ;;  %v217_v33 = vmax.f32 %v167_v17, 0.0  ;;  %s587_s29 = sshll.u32 %s778_s6, 4  ;;  %s588_s29 = int_to_ptr.vmem [resolvable:$true] %s587_s29 }
  0xea   :  { %v220_v30 = vmax.f32 %v178_v21, 0.0  ;;  %v225_v31 = vmax.f32 %v199_v23, 0.0  ;;  %v202_v32 = vadd.f32 %v598_v48, %v201_v28  ;;  %s754_s30 = scalar_lea.vmem %s588_s29, 2048  ;;  %p759_p1 = scmp.lt.s32.totalorder %s588_s29, %s588_s29 }
  0xeb   :  { %v218_v34 = vmax.f32 %v170_v25, 0.0  ;;  %v228_v35 = vmax.f32 %v210_v27, 0.0  ;;  %p755_p0 = scmp.ne.s32.totalorder %s588_s29, %s754_s30  ;;  %p760_p2 = scmp.lt.s32.totalorder %s754_s30, %s754_s30 }
  0xec   :  { %v241_v36 = vpack.c.bf16 %v220_v30, %v219_v29  ;;  %v226_v37 = vmax.f32 %v202_v32, 0.0 }
  0xed   :  { %v240_v38 = vpack.c.bf16 %v218_v34, %v217_v33  ;;  %v245_v39 = vpack.c.bf16 %v228_v35, %v227_v26  ;;  %p761_p3 = por %p760_p2, %p759_p1 }
  0xee   :  { %v244_v40 = vpack.c.bf16 %v226_v37, %v225_v31 }
  0xef   :  { %701 = vmatprep.mubr.msk.bf16.mxu1 %vm276_vm1, %v240_v38  ;;  %p762_p4 = pnand %p761_p3, %p755_p0 }
  0xf0   :  { %702 = vmatmul.mubr.msk.bf16.gmra.mrb[12].mxu1 %vm276_vm1, %v241_v36 }
  0xf1   :  { %705 = vmatprep.mubr.msk.bf16.mxu1 %vm276_vm1, %v242_v15 }
  0xf8   :  { %706 = vmatmul.mubr.msk.bf16.gmra.mrb[16].mxu1 %vm276_vm1, %v243_v12 }
  0xf9   :  { %709 = vmatprep.mubr.msk.bf16.mxu1 %vm276_vm1, %v244_v40 }
 0x100   :  { %710 = vmatmul.mubr.msk.bf16.gmra.mrb[20].mxu1 %vm276_vm1, %v245_v39 }
 0x1bb   :  { %v699_v43 = vpop.f32.mrb[8].mxu1 }
 0x1bc   :  { %v335_v45 = vpop.f32.mrb[9].mxu1  ;;  %v344_v47 = vadd.f32 %v699_v43, %v609_v44 }
 0x1bd   :  { %v700_v46 = vpop.f32.mrb[10].mxu1  ;;  %v336_v50 = vadd.f32 %v609_v44, %v335_v45 }
 0x1be   :  { %v347_v48 = vadd.f32 %v700_v46, %v609_v44  ;;  %v338_v49 = vpop.f32.mrb[11].mxu1 }
 0x1bf   :  { %v339_v51 = vadd.f32 %v609_v44, %v338_v49 }
 0x1c0   :  { %v408_v52 = vpack.c.bf16 %v347_v48, %v344_v47 }
 0x1c1   :  { %v407_v53 = vpack.c.bf16 %v339_v51, %v336_v50 }
 0x1c3   :  { %v703_v54 = vpop.f32.mrb[12].mxu1  ;;  %721 = vmatprep.mubr.msk.bf16.mxu0 %vm276_vm1, %v407_v53 }
 0x1c4   :  { %v351_v55 = vpop.f32.mrb[13].mxu1  ;;  %722 = vmatmul.mubr.msk.bf16.vlgmr.msra.gmra.mrb[8].mxu0 %vm276_vm1, %v408_v52  ;;  %v360_v57 = vadd.f32 %v703_v54, %v609_v44 }
 0x1c5   :  { %v704_v56 = vpop.f32.mrb[14].mxu1  ;;  %v352_v60 = vadd.f32 %v609_v44, %v351_v55 }
 0x1c6   :  { %v363_v58 = vadd.f32 %v704_v56, %v609_v44  ;;  %v354_v59 = vpop.f32.mrb[15].mxu1 }
 0x1c7   :  { %v355_v61 = vadd.f32 %v609_v44, %v354_v59 }
 0x1c8   :  { %v410_v62 = vpack.c.bf16 %v363_v58, %v360_v57 }
 0x1c9   :  { %v409_v63 = vpack.c.bf16 %v355_v61, %v352_v60 }
 0x1cb   :  { %v707_v0 = vpop.f32.mrb[16].mxu1  ;;  %725 = vmatprep.mubr.msk.bf16.mxu0 %vm276_vm1, %v409_v63 }
 0x1cc   :  { %v367_v1 = vpop.f32.mrb[17].mxu1  ;;  %726 = vmatmul.mubr.msk.bf16.gmra.mrb[12].mxu0 %vm276_vm1, %v410_v62  ;;  %v376_v3 = vadd.f32 %v707_v0, %v609_v44 }
 0x1cd   :  { %v708_v2 = vpop.f32.mrb[18].mxu1  ;;  %v368_v6 = vadd.f32 %v609_v44, %v367_v1 }
 0x1ce   :  { %v379_v4 = vadd.f32 %v708_v2, %v609_v44  ;;  %v370_v5 = vpop.f32.mrb[19].mxu1 }
 0x1cf   :  { %v371_v7 = vadd.f32 %v609_v44, %v370_v5 }
 0x1d0   :  { %v412_v8 = vpack.c.bf16 %v379_v4, %v376_v3 }
 0x1d1   :  { %v411_v9 = vpack.c.bf16 %v371_v7, %v368_v6 }
 0x1d3   :  { %v711_v10 = vpop.f32.mrb[20].mxu1  ;;  %729 = vmatprep.mubr.msk.bf16.mxu0 %vm276_vm1, %v411_v9 }
 0x1d4   :  { %v383_v11 = vpop.f32.mrb[21].mxu1  ;;  %730 = vmatmul.mubr.msk.bf16.gmra.mrb[16].mxu0 %vm276_vm1, %v412_v8  ;;  %v392_v13 = vadd.f32 %v711_v10, %v609_v44 }
 0x1d5   :  { %v712_v12 = vpop.f32.mrb[22].mxu1  ;;  %v384_v16 = vadd.f32 %v609_v44, %v383_v11 }
 0x1d6   :  { %v395_v14 = vadd.f32 %v712_v12, %v609_v44  ;;  %v386_v15 = vpop.f32.mrb[23].mxu1 }
 0x1d7   :  { %v387_v17 = vadd.f32 %v609_v44, %v386_v15 }
 0x1d8   :  { %v414_v18 = vpack.c.bf16 %v395_v14, %v392_v13 }
 0x1d9   :  { %v413_v19 = vpack.c.bf16 %v387_v17, %v384_v16 }
 0x1db   :  { %733 = vmatprep.mubr.msk.bf16.mxu0 %vm276_vm1, %v413_v19 }
 0x1dc   :  { %734 = vmatmul.mubr.msk.bf16.gmra.mrb[20].mxu0 %vm276_vm1, %v414_v18 }
 0x297   :  { %v723_v21 = vpop.f32.mrb[8].mxu0 }
 0x298   :  { %v512_v22 = vadd.f32 %v723_v21, %v622_v20  ;;  %v503_v23 = vpop.f32.mrb[9].mxu0 }
 0x299   :  { %v504_v24 = vadd.f32 %v622_v20, %v503_v23  ;;  %v724_v25 = vpop.f32.mrb[10].mxu0 }
 0x29a   :  { %568 = vst [vmem:[#allocation2 + $0x10] sm:$0xff] %v512_v22  ;;  %v515_v26 = vadd.f32 %v724_v25, %v622_v20  ;;  %v506_v27 = vpop.f32.mrb[11].mxu0 }
 0x29b   :  { %566 = vst [vmem:[#allocation2] sm:$0xff] %v504_v24  ;;  %v507_v28 = vadd.f32 %v622_v20, %v506_v27 }
 0x29c   :  { %569 = vst [vmem:[#allocation2 + $0x18] sm:$0xff] %v515_v26 }
 0x29d   :  { %567 = vst [vmem:[#allocation2 + $0x8] sm:$0xff] %v507_v28 }
 0x29f   :  { %v727_v29 = vpop.f32.mrb[12].mxu0 }
 0x2a0   :  { %v528_v30 = vadd.f32 %v727_v29, %v622_v20  ;;  %v519_v31 = vpop.f32.mrb[13].mxu0 }
 0x2a1   :  { %v520_v32 = vadd.f32 %v622_v20, %v519_v31  ;;  %v728_v33 = vpop.f32.mrb[14].mxu0 }
 0x2a2   :  { %572 = vst [vmem:[#allocation2 + $0x30] sm:$0xff] %v528_v30  ;;  %v531_v34 = vadd.f32 %v728_v33, %v622_v20  ;;  %v522_v35 = vpop.f32.mrb[15].mxu0 }
 0x2a3   :  { %570 = vst [vmem:[#allocation2 + $0x20] sm:$0xff] %v520_v32  ;;  %v523_v36 = vadd.f32 %v622_v20, %v522_v35 }
 0x2a4   :  { %573 = vst [vmem:[#allocation2 + $0x38] sm:$0xff] %v531_v34 }
 0x2a5   :  { %571 = vst [vmem:[#allocation2 + $0x28] sm:$0xff] %v523_v36 }
 0x2a7   :  { %v731_v37 = vpop.f32.mrb[16].mxu0 }
 0x2a8   :  { %v544_v38 = vadd.f32 %v731_v37, %v622_v20  ;;  %v535_v39 = vpop.f32.mrb[17].mxu0 }
 0x2a9   :  { %v536_v40 = vadd.f32 %v622_v20, %v535_v39  ;;  %v732_v41 = vpop.f32.mrb[18].mxu0 }
 0x2aa   :  { %576 = vst [vmem:[#allocation2 + $0x50] sm:$0xff] %v544_v38  ;;  %v547_v42 = vadd.f32 %v732_v41, %v622_v20  ;;  %v538_v43 = vpop.f32.mrb[19].mxu0 }
 0x2ab   :  { %574 = vst [vmem:[#allocation2 + $0x40] sm:$0xff] %v536_v40  ;;  %v539_v44 = vadd.f32 %v622_v20, %v538_v43 }
 0x2ac   :  { %577 = vst [vmem:[#allocation2 + $0x58] sm:$0xff] %v547_v42 }
 0x2ad   :  { %575 = vst [vmem:[#allocation2 + $0x48] sm:$0xff] %v539_v44 }
 0x2af   :  { %v735_v45 = vpop.f32.mrb[20].mxu0 }
 0x2b0   :  { %v560_v46 = vadd.f32 %v735_v45, %v622_v20  ;;  %v551_v47 = vpop.f32.mrb[21].mxu0 }
 0x2b1   :  { %v552_v48 = vadd.f32 %v622_v20, %v551_v47  ;;  %v736_v49 = vpop.f32.mrb[22].mxu0 }
 0x2b2   :  { %580 = vst [vmem:[#allocation2 + $0x70] sm:$0xff] %v560_v46  ;;  %v563_v50 = vadd.f32 %v736_v49, %v622_v20  ;;  %v554_v51 = vpop.f32.mrb[23].mxu0 }
 0x2b3   :  { %578 = vst [vmem:[#allocation2 + $0x60] sm:$0xff] %v552_v48  ;;  %v555_v52 = vadd.f32 %v622_v20, %v554_v51 }
 0x2b4   :  { %581 = vst [vmem:[#allocation2 + $0x78] sm:$0xff] %v563_v50 }
 0x2b5   :  { %579 = vst [vmem:[#allocation2 + $0x68] sm:$0xff] %v555_v52 }
 0x2b6   :  { %765 = shalt.err (!%p762_p4)
}
 0x2b7   :  { %s766_s10 = scalar_lea.hbm %s951_s7, 2048 }
 0x2b8   :  { %p767_p5 = scmp.ne.s32.totalorder %s951_s7, %s766_s10  ;;  %p770_p6 = scmp.lt.u32.totalorder %s766_s10, %s951_s7 }
 0x2ba   :  { %p772_p7 = pnand %p770_p6, %p767_p5 }
 0x2bc   :  { %775 = shalt.err (!%p772_p7)
}
 0x2bd   :  { %s779_s14 = smov 128   ;;  %s780_s15 = smov 8  }
 0x2be   :  { %593 = dma.vmem_to_hbm [thread:$0]  %s588_s29, 2048, %s951_s7, [#allocation3], %s779_s14, %s779_s14, %s780_s15  }
 0x2bf   :  { %776 = dma.done.wait [#allocation3], 2048  }
 0x2c0   :  { %777 = vsyncadd [#allocation3], 4294965248 }
 0x2c1   :  { %597 = vsyncpa [#allocation3], 1 }

// kernel: tpu_custom_call.1
= control target key start
LH: loop header
LB: loop body
LE: loop exit
PB: predicated region body
PF: predicated region fallthrough
CT: control target
= control target key end

     0   :  { %vm91_vm0 = vcmask 261120   ;;  %s944_s0 = inlined_call_operand.vmem [shape: f32[128,32], index: 0, kind: input, shape index: {}]   ;;  %s945_s1 = inlined_call_operand.vmem [shape: bf16[32,64], index: 1, kind: input, shape index: {}]   ;;  %s946_s2 = inlined_call_operand.vmem [shape: f32[1,64], index: 2, kind: input, shape index: {}]   ;;  %s947_s3 = inlined_call_operand.vmem [shape: bf16[64,64], index: 3, kind: input, shape index: {}]   ;;  %s948_s4 = inlined_call_operand.vmem [shape: f32[1,64], index: 4, kind: input, shape index: {}]   ;;  %s949_s5 = inlined_call_operand.vmem [shape: bf16[64,128], index: 5, kind: input, shape index: {}]   ;;  %s950_s6 = inlined_call_operand.vmem [shape: f32[1,128], index: 6, kind: input, shape index: {}]   ;;  %s951_s7 = inlined_call_operand.hbm [shape: f32[128,128], index: 7, kind: output, shape index: {}]  }
   0x1   :  { %v744_v0 = vld [vmem:[%s945_s1] sm:$0xff]   ;;  %v745_v1 = vld [vmem:[%s945_s1 + $0x8] sm:$0xff]   ;;  %v30_v4 = vld [vmem:[%s944_s0 + $0x10] sm:$0xff] }
   0x2   :  { %669 = vmatprep.subr.bf16.mxu0 %v744_v0  ;;  %v28_v2 = vld [vmem:[%s944_s0] sm:$0xff]  ;;  %v29_v3 = vld [vmem:[%s944_s0 + $0x8] sm:$0xff]  ;;  %737 = vmatprep.subr.bf16.mxu1 %v744_v0  ;;  %v31_v7 = vld [vmem:[%s944_s0 + $0x18] sm:$0xff]  ;;  %v46_v8 = vmax.f32 %v30_v4, 0.0 }
   0x3   :  { %670 = vmatpush3.bf16.msra.mxu0 %v744_v0  ;;  %v44_v5 = vmax.f32 %v28_v2, 0.0  ;;  %v45_v6 = vmax.f32 %v29_v3, 0.0  ;;  %739 = vmatpush3.bf16.msra.mxu1 %v744_v0  ;;  %v32_v9 = vld [vmem:[%s944_s0 + $0x20] sm:$0xff]  ;;  %v33_v10 = vld [vmem:[%s944_s0 + $0x28] sm:$0xff]  ;;  %v47_v11 = vmax.f32 %v31_v7, 0.0  ;;  %v34_v14 = vld [vmem:[%s944_s0 + $0x30] sm:$0xff] }
   0x4   :  { %671 = vmatprep.subr.bf16.mxu0 %v745_v1  ;;  %v48_v12 = vmax.f32 %v32_v9, 0.0  ;;  %v49_v13 = vmax.f32 %v33_v10, 0.0  ;;  %v35_v15 = vld [vmem:[%s944_s0 + $0x38] sm:$0xff]  ;;  %738 = vmatprep.subr.bf16.mxu1 %v745_v1  ;;  %v36_v16 = vld [vmem:[%s944_s0 + $0x40] sm:$0xff]  ;;  %v50_v18 = vmax.f32 %v34_v14, 0.0  ;;  %v37_v19 = vld [vmem:[%s944_s0 + $0x48] sm:$0xff] }
   0x5   :  { %v65_v17 = vpack.c.bf16 %v45_v6, %v44_v5  ;;  %v52_v20 = vmax.f32 %v36_v16, 0.0  ;;  %v38_v21 = vld [vmem:[%s944_s0 + $0x50] sm:$0xff]  ;;  %v39_v22 = vld [vmem:[%s944_s0 + $0x58] sm:$0xff]  ;;  %v66_v23 = vpack.c.bf16 %v47_v11, %v46_v8  ;;  %v51_v24 = vmax.f32 %v35_v15, 0.0  ;;  %v40_v27 = vld [vmem:[%s944_s0 + $0x60] sm:$0xff] }
   0x6   :  { %v53_v25 = vmax.f32 %v37_v19, 0.0  ;;  %v54_v26 = vmax.f32 %v38_v21, 0.0  ;;  %v41_v28 = vld [vmem:[%s944_s0 + $0x68] sm:$0xff]  ;;  %v42_v29 = vld [vmem:[%s944_s0 + $0x70] sm:$0xff]  ;;  %v67_v30 = vpack.c.bf16 %v49_v13, %v48_v12  ;;  %v55_v31 = vmax.f32 %v39_v22, 0.0  ;;  %v43_v34 = vld [vmem:[%s944_s0 + $0x78] sm:$0xff] }
   0x7   :  { %672 = vmatpush3.bf16.msra.mxu0 %v745_v1  ;;  %673 = vmatprep.mubr.msk.bf16.mxu0 %vm91_vm0, %v65_v17  ;;  %v56_v32 = vmax.f32 %v40_v27, 0.0  ;;  %v57_v33 = vmax.f32 %v41_v28, 0.0  ;;  %v58_v36 = vmax.f32 %v42_v29, 0.0  ;;  %v59_v37 = vmax.f32 %v43_v34, 0.0  ;;  %v746_v38 = vld [vmem:[%s947_s3] sm:$0xff]   ;;  %v747_v39 = vld [vmem:[%s947_s3 + $0x8] sm:$0xff]  }
   0x8   :  { %740 = vmatpush3.bf16.msra.mxu1 %v745_v1  ;;  %v69_v35 = vpack.c.bf16 %v53_v25, %v52_v20  ;;  %v70_v40 = vpack.c.bf16 %v55_v31, %v54_v26 }
   0x9   :  { %v71_v41 = vpack.c.bf16 %v57_v33, %v56_v32  ;;  %689 = vmatprep.subr.bf16.mxu1 %v746_v38 }
   0xa   :  { %674 = vmatmul.mubr.msk.bf16.vlgmr.msra.gmra.mrb[0].mxu0 %vm91_vm0, %v66_v23  ;;  %681 = vmatprep.mubr.msk.bf16.mxu1 %vm91_vm0, %v69_v35 }
   0xb   :  { %677 = vmatprep.mubr.msk.bf16.mxu0 %vm91_vm0, %v67_v30  ;;  %682 = vmatmul.mubr.msk.bf16.vlgmr.msra.gmra.mrb[0].mxu1 %vm91_vm0, %v70_v40 }
   0xc   :  { %685 = vmatprep.mubr.msk.bf16.mxu1 %vm91_vm0, %v71_v41  ;;  %690 = vmatpush3.bf16.msra.mxu1 %v746_v38 }
   0xd   :  { %12 = vsyncpa [#allocation3], 0  ;;  %v68_v42 = vpack.c.bf16 %v51_v24, %v50_v18  ;;  %691 = vmatprep.subr.bf16.mxu1 %v747_v39  ;;  %v72_v43 = vpack.c.bf16 %v59_v37, %v58_v36  ;;  %v748_v44 = vld [vmem:[%s947_s3 + $0x10] sm:$0xff]   ;;  %v749_v45 = vld [vmem:[%s947_s3 + $0x18] sm:$0xff]   ;;  %vm276_vm1 = vcmask 523264  }
   0xe   :  { %v750_v46 = vld [vmem:[%s949_s5] sm:$0xff]   ;;  %v751_v47 = vld [vmem:[%s949_s5 + $0x8] sm:$0xff]   ;;  %v752_v41 = vld [vmem:[%s949_s5 + $0x10] sm:$0xff]  }
   0xf   :  { %713 = vmatprep.subr.bf16.mxu0 %v750_v46  ;;  %v598_v48 = vld [vmem:[%s946_s2] ss:$0 sm:$0xff] }
  0x10   :  { %692 = vmatpush3.bf16.msra.mxu1 %v747_v39  ;;  %714 = vmatpush3.bf16.msra.mxu0 %v750_v46 }
  0x11   :  { %693 = vmatprep.subr.bf16.mxu1 %v748_v44  ;;  %715 = vmatprep.subr.bf16.mxu0 %v751_v47 }
  0x12   :  { %678 = vmatmul.mubr.msk.bf16.gmra.mrb[4].mxu0 %vm91_vm0, %v68_v42  ;;  %v753_v42 = vld [vmem:[%s949_s5 + $0x18] sm:$0xff]  }
  0x13   :  { %686 = vmatmul.mubr.msk.bf16.gmra.mrb[4].mxu1 %vm91_vm0, %v72_v43 }
  0x14   :  { %694 = vmatpush3.bf16.msra.mxu1 %v748_v44  ;;  %716 = vmatpush3.bf16.msra.mxu0 %v751_v47  ;;  %v609_v44 = vld [vmem:[%s948_s4] ss:$0 sm:$0xff] }
  0x15   :  { %695 = vmatprep.subr.bf16.mxu1 %v749_v45  ;;  %717 = vmatprep.subr.bf16.mxu0 %v752_v41 }
  0x18   :  { %696 = vmatpush3.bf16.msra.mxu1 %v749_v45  ;;  %718 = vmatpush3.bf16.msra.mxu0 %v752_v41 }
  0x19   :  { %719 = vmatprep.subr.bf16.mxu0 %v753_v42 }
  0x1c   :  { %720 = vmatpush3.bf16.msra.mxu0 %v753_v42 }
  0xdd   :  { %v675_v49 = vpop.f32.mrb[0].mxu0 }
  0xde   :  { %v159_v50 = vadd.f32 %v675_v49, %v598_v48  ;;  %v150_v51 = vpop.f32.mrb[1].mxu0  ;;  %v683_v52 = vpop.f32.mrb[0].mxu1 }
  0xdf   :  { %v151_v53 = vadd.f32 %v598_v48, %v150_v51  ;;  %v676_v54 = vpop.f32.mrb[2].mxu0  ;;  %v191_v55 = vadd.f32 %v683_v52, %v598_v48  ;;  %v182_v56 = vpop.f32.mrb[1].mxu1 }
  0xe0   :  { %v162_v57 = vadd.f32 %v676_v54, %v598_v48  ;;  %v153_v58 = vpop.f32.mrb[3].mxu0  ;;  %v183_v59 = vadd.f32 %v598_v48, %v182_v56  ;;  %v684_v60 = vpop.f32.mrb[2].mxu1  ;;  %v215_v1 = vmax.f32 %v159_v50, 0.0 }
  0xe1   :  { %v154_v61 = vadd.f32 %v598_v48, %v153_v58  ;;  %v223_v62 = vmax.f32 %v191_v55, 0.0  ;;  %v194_v63 = vadd.f32 %v684_v60, %v598_v48  ;;  %v185_v0 = vpop.f32.mrb[3].mxu1  ;;  %v213_v5 = vmax.f32 %v151_v53, 0.0 }
  0xe2   :  { %v216_v2 = vmax.f32 %v162_v57, 0.0  ;;  %v221_v3 = vmax.f32 %v183_v59, 0.0  ;;  %v186_v4 = vadd.f32 %v598_v48, %v185_v0 }
  0xe3   :  { %v214_v6 = vmax.f32 %v154_v61, 0.0  ;;  %v224_v7 = vmax.f32 %v194_v63, 0.0 }
  0xe4   :  { %v239_v8 = vpack.c.bf16 %v216_v2, %v215_v1  ;;  %v222_v9 = vmax.f32 %v186_v4, 0.0 }
  0xe5   :  { %v238_v10 = vpack.c.bf16 %v214_v6, %v213_v5  ;;  %v679_v11 = vpop.f32.mrb[4].mxu0  ;;  %v243_v12 = vpack.c.bf16 %v224_v7, %v223_v62 }
  0xe6   :  { %v175_v13 = vadd.f32 %v679_v11, %v598_v48  ;;  %v166_v14 = vpop.f32.mrb[5].mxu0  ;;  %v242_v15 = vpack.c.bf16 %v222_v9, %v221_v3  ;;  %v687_v16 = vpop.f32.mrb[4].mxu1 }
  0xe7   :  { %v167_v17 = vadd.f32 %v598_v48, %v166_v14  ;;  %v680_v18 = vpop.f32.mrb[6].mxu0  ;;  %697 = vmatprep.mubr.msk.bf16.mxu1 %vm276_vm1, %v238_v10  ;;  %v207_v19 = vadd.f32 %v687_v16, %v598_v48  ;;  %v198_v20 = vpop.f32.mrb[5].mxu1 }
  0xe8   :  { %v178_v21 = vadd.f32 %v680_v18, %v598_v48  ;;  %v169_v22 = vpop.f32.mrb[7].mxu0  ;;  %698 = vmatmul.mubr.msk.bf16.vlgmr.msra.gmra.mrb[8].mxu1 %vm276_vm1, %v239_v8  ;;  %v199_v23 = vadd.f32 %v598_v48, %v198_v20  ;;  %v688_v24 = vpop.f32.mrb[6].mxu1  ;;  %v219_v29 = vmax.f32 %v175_v13, 0.0  ;;  %v622_v20 = vld [vmem:[%s950_s6] ss:$0 sm:$0xff]  ;;  %s778_s6 = smov [#allocation2]  }
  0xe9   :  { %v170_v25 = vadd.f32 %v598_v48, %v169_v22  ;;  %v227_v26 = vmax.f32 %v207_v19, 0.0  ;;  %v210_v27 = vadd.f32 %v688_v24, %v598_v48  ;;  %v201_v28 = vpop.f32.mrb[7].mxu1  ;;  %v217_v33 = vmax.f32 %v167_v17, 0.0  ;;  %s587_s29 = sshll.u32 %s778_s6, 4  ;;  %s588_s29 = int_to_ptr.vmem [resolvable:$true] %s587_s29 }
  0xea   :  { %v220_v30 = vmax.f32 %v178_v21, 0.0  ;;  %v225_v31 = vmax.f32 %v199_v23, 0.0  ;;  %v202_v32 = vadd.f32 %v598_v48, %v201_v28  ;;  %s754_s30 = scalar_lea.vmem %s588_s29, 2048  ;;  %p759_p1 = scmp.lt.s32.totalorder %s588_s29, %s588_s29 }
  0xeb   :  { %v218_v34 = vmax.f32 %v170_v25, 0.0  ;;  %v228_v35 = vmax.f32 %v210_v27, 0.0  ;;  %p755_p0 = scmp.ne.s32.totalorder %s588_s29, %s754_s30  ;;  %p760_p2 = scmp.lt.s32.totalorder %s754_s30, %s754_s30 }
  0xec   :  { %v241_v36 = vpack.c.bf16 %v220_v30, %v219_v29  ;;  %v226_v37 = vmax.f32 %v202_v32, 0.0 }
  0xed   :  { %v240_v38 = vpack.c.bf16 %v218_v34, %v217_v33  ;;  %v245_v39 = vpack.c.bf16 %v228_v35, %v227_v26  ;;  %p761_p3 = por %p760_p2, %p759_p1 }
  0xee   :  { %v244_v40 = vpack.c.bf16 %v226_v37, %v225_v31 }
  0xef   :  { %701 = vmatprep.mubr.msk.bf16.mxu1 %vm276_vm1, %v240_v38  ;;  %p762_p4 = pnand %p761_p3, %p755_p0 }
  0xf0   :  { %702 = vmatmul.mubr.msk.bf16.gmra.mrb[12].mxu1 %vm276_vm1, %v241_v36 }
  0xf1   :  { %705 = vmatprep.mubr.msk.bf16.mxu1 %vm276_vm1, %v242_v15 }
  0xf8   :  { %706 = vmatmul.mubr.msk.bf16.gmra.mrb[16].mxu1 %vm276_vm1, %v243_v12 }
  0xf9   :  { %709 = vmatprep.mubr.msk.bf16.mxu1 %vm276_vm1, %v244_v40 }
 0x100   :  { %710 = vmatmul.mubr.msk.bf16.gmra.mrb[20].mxu1 %vm276_vm1, %v245_v39 }
 0x1bb   :  { %v699_v43 = vpop.f32.mrb[8].mxu1 }
 0x1bc   :  { %v335_v45 = vpop.f32.mrb[9].mxu1  ;;  %v344_v47 = vadd.f32 %v699_v43, %v609_v44 }
 0x1bd   :  { %v700_v46 = vpop.f32.mrb[10].mxu1  ;;  %v336_v50 = vadd.f32 %v609_v44, %v335_v45 }
 0x1be   :  { %v347_v48 = vadd.f32 %v700_v46, %v609_v44  ;;  %v338_v49 = vpop.f32.mrb[11].mxu1 }
 0x1bf   :  { %v339_v51 = vadd.f32 %v609_v44, %v338_v49 }
 0x1c0   :  { %v408_v52 = vpack.c.bf16 %v347_v48, %v344_v47 }
 0x1c1   :  { %v407_v53 = vpack.c.bf16 %v339_v51, %v336_v50 }
 0x1c3   :  { %v703_v54 = vpop.f32.mrb[12].mxu1  ;;  %721 = vmatprep.mubr.msk.bf16.mxu0 %vm276_vm1, %v407_v53 }
 0x1c4   :  { %v351_v55 = vpop.f32.mrb[13].mxu1  ;;  %722 = vmatmul.mubr.msk.bf16.vlgmr.msra.gmra.mrb[8].mxu0 %vm276_vm1, %v408_v52  ;;  %v360_v57 = vadd.f32 %v703_v54, %v609_v44 }
 0x1c5   :  { %v704_v56 = vpop.f32.mrb[14].mxu1  ;;  %v352_v60 = vadd.f32 %v609_v44, %v351_v55 }
 0x1c6   :  { %v363_v58 = vadd.f32 %v704_v56, %v609_v44  ;;  %v354_v59 = vpop.f32.mrb[15].mxu1 }
 0x1c7   :  { %v355_v61 = vadd.f32 %v609_v44, %v354_v59 }
 0x1c8   :  { %v410_v62 = vpack.c.bf16 %v363_v58, %v360_v57 }
 0x1c9   :  { %v409_v63 = vpack.c.bf16 %v355_v61, %v352_v60 }
 0x1cb   :  { %v707_v0 = vpop.f32.mrb[16].mxu1  ;;  %725 = vmatprep.mubr.msk.bf16.mxu0 %vm276_vm1, %v409_v63 }
 0x1cc   :  { %v367_v1 = vpop.f32.mrb[17].mxu1  ;;  %726 = vmatmul.mubr.msk.bf16.gmra.mrb[12].mxu0 %vm276_vm1, %v410_v62  ;;  %v376_v3 = vadd.f32 %v707_v0, %v609_v44 }
 0x1cd   :  { %v708_v2 = vpop.f32.mrb[18].mxu1  ;;  %v368_v6 = vadd.f32 %v609_v44, %v367_v1 }
 0x1ce   :  { %v379_v4 = vadd.f32 %v708_v2, %v609_v44  ;;  %v370_v5 = vpop.f32.mrb[19].mxu1 }
 0x1cf   :  { %v371_v7 = vadd.f32 %v609_v44, %v370_v5 }
 0x1d0   :  { %v412_v8 = vpack.c.bf16 %v379_v4, %v376_v3 }
 0x1d1   :  { %v411_v9 = vpack.c.bf16 %v371_v7, %v368_v6 }
 0x1d3   :  { %v711_v10 = vpop.f32.mrb[20].mxu1  ;;  %729 = vmatprep.mubr.msk.bf16.mxu0 %vm276_vm1, %v411_v9 }
 0x1d4   :  { %v383_v11 = vpop.f32.mrb[21].mxu1  ;;  %730 = vmatmul.mubr.msk.bf16.gmra.mrb[16].mxu0 %vm276_vm1, %v412_v8  ;;  %v392_v13 = vadd.f32 %v711_v10, %v609_v44 }
 0x1d5   :  { %v712_v12 = vpop.f32.mrb[22].mxu1  ;;  %v384_v16 = vadd.f32 %v609_v44, %v383_v11 }
 0x1d6   :  { %v395_v14 = vadd.f32 %v712_v12, %v609_v44  ;;  %v386_v15 = vpop.f32.mrb[23].mxu1 }
 0x1d7   :  { %v387_v17 = vadd.f32 %v609_v44, %v386_v15 }
 0x1d8   :  { %v414_v18 = vpack.c.bf16 %v395_v14, %v392_v13 }
 0x1d9   :  { %v413_v19 = vpack.c.bf16 %v387_v17, %v384_v16 }
 0x1db   :  { %733 = vmatprep.mubr.msk.bf16.mxu0 %vm276_vm1, %v413_v19 }
 0x1dc   :  { %734 = vmatmul.mubr.msk.bf16.gmra.mrb[20].mxu0 %vm276_vm1, %v414_v18 }
 0x297   :  { %v723_v21 = vpop.f32.mrb[8].mxu0 }
 0x298   :  { %v512_v22 = vadd.f32 %v723_v21, %v622_v20  ;;  %v503_v23 = vpop.f32.mrb[9].mxu0 }
 0x299   :  { %v504_v24 = vadd.f32 %v622_v20, %v503_v23  ;;  %v724_v25 = vpop.f32.mrb[10].mxu0 }
 0x29a   :  { %568 = vst [vmem:[#allocation2 + $0x10] sm:$0xff] %v512_v22  ;;  %v515_v26 = vadd.f32 %v724_v25, %v622_v20  ;;  %v506_v27 = vpop.f32.mrb[11].mxu0 }
 0x29b   :  { %566 = vst [vmem:[#allocation2] sm:$0xff] %v504_v24  ;;  %v507_v28 = vadd.f32 %v622_v20, %v506_v27 }
 0x29c   :  { %569 = vst [vmem:[#allocation2 + $0x18] sm:$0xff] %v515_v26 }
 0x29d   :  { %567 = vst [vmem:[#allocation2 + $0x8] sm:$0xff] %v507_v28 }
 0x29f   :  { %v727_v29 = vpop.f32.mrb[12].mxu0 }
 0x2a0   :  { %v528_v30 = vadd.f32 %v727_v29, %v622_v20  ;;  %v519_v31 = vpop.f32.mrb[13].mxu0 }
 0x2a1   :  { %v520_v32 = vadd.f32 %v622_v20, %v519_v31  ;;  %v728_v33 = vpop.f32.mrb[14].mxu0 }
 0x2a2   :  { %572 = vst [vmem:[#allocation2 + $0x30] sm:$0xff] %v528_v30  ;;  %v531_v34 = vadd.f32 %v728_v33, %v622_v20  ;;  %v522_v35 = vpop.f32.mrb[15].mxu0 }
 0x2a3   :  { %570 = vst [vmem:[#allocation2 + $0x20] sm:$0xff] %v520_v32  ;;  %v523_v36 = vadd.f32 %v622_v20, %v522_v35 }
 0x2a4   :  { %573 = vst [vmem:[#allocation2 + $0x38] sm:$0xff] %v531_v34 }
 0x2a5   :  { %571 = vst [vmem:[#allocation2 + $0x28] sm:$0xff] %v523_v36 }
 0x2a7   :  { %v731_v37 = vpop.f32.mrb[16].mxu0 }
 0x2a8   :  { %v544_v38 = vadd.f32 %v731_v37, %v622_v20  ;;  %v535_v39 = vpop.f32.mrb[17].mxu0 }
 0x2a9   :  { %v536_v40 = vadd.f32 %v622_v20, %v535_v39  ;;  %v732_v41 = vpop.f32.mrb[18].mxu0 }
 0x2aa   :  { %576 = vst [vmem:[#allocation2 + $0x50] sm:$0xff] %v544_v38  ;;  %v547_v42 = vadd.f32 %v732_v41, %v622_v20  ;;  %v538_v43 = vpop.f32.mrb[19].mxu0 }
 0x2ab   :  { %574 = vst [vmem:[#allocation2 + $0x40] sm:$0xff] %v536_v40  ;;  %v539_v44 = vadd.f32 %v622_v20, %v538_v43 }
 0x2ac   :  { %577 = vst [vmem:[#allocation2 + $0x58] sm:$0xff] %v547_v42 }
 0x2ad   :  { %575 = vst [vmem:[#allocation2 + $0x48] sm:$0xff] %v539_v44 }
 0x2af   :  { %v735_v45 = vpop.f32.mrb[20].mxu0 }
 0x2b0   :  { %v560_v46 = vadd.f32 %v735_v45, %v622_v20  ;;  %v551_v47 = vpop.f32.mrb[21].mxu0 }
 0x2b1   :  { %v552_v48 = vadd.f32 %v622_v20, %v551_v47  ;;  %v736_v49 = vpop.f32.mrb[22].mxu0 }
 0x2b2   :  { %580 = vst [vmem:[#allocation2 + $0x70] sm:$0xff] %v560_v46  ;;  %v563_v50 = vadd.f32 %v736_v49, %v622_v20  ;;  %v554_v51 = vpop.f32.mrb[23].mxu0 }
 0x2b3   :  { %578 = vst [vmem:[#allocation2 + $0x60] sm:$0xff] %v552_v48  ;;  %v555_v52 = vadd.f32 %v622_v20, %v554_v51 }
 0x2b4   :  { %581 = vst [vmem:[#allocation2 + $0x78] sm:$0xff] %v563_v50 }
 0x2b5   :  { %579 = vst [vmem:[#allocation2 + $0x68] sm:$0xff] %v555_v52 }
 0x2b6   :  { %765 = shalt.err (!%p762_p4)
}
 0x2b7   :  { %s766_s10 = scalar_lea.hbm %s951_s7, 2048 }
 0x2b8   :  { %p767_p5 = scmp.ne.s32.totalorder %s951_s7, %s766_s10  ;;  %p770_p6 = scmp.lt.u32.totalorder %s766_s10, %s951_s7 }
 0x2ba   :  { %p772_p7 = pnand %p770_p6, %p767_p5 }
 0x2bc   :  { %775 = shalt.err (!%p772_p7)
}
 0x2bd   :  { %s779_s14 = smov 128   ;;  %s780_s15 = smov 8  }
 0x2be   :  { %593 = dma.vmem_to_hbm [thread:$0]  %s588_s29, 2048, %s951_s7, [#allocation3], %s779_s14, %s779_s14, %s780_s15  }
 0x2bf   :  { %776 = dma.done.wait [#allocation3], 2048  }
 0x2c0   :  { %777 = vsyncadd [#allocation3], 4294965248 }
 0x2c1   :  { %597 = vsyncpa [#allocation3], 1 }

</bundles_post_ra>
